<compile_context>
chip_gen: v7x
topology: tpu7x:2x2x1
jax: 0.10.0
libtpu: 0.0.40
codegen_flags: <defaults>
</compile_context>

<pallas_src>
import functools

import jax
import jax.numpy as jnp
from jax.experimental import pallas as pl
from jax.experimental.pallas import tpu as pltpu


def _round_up(v, m):
    return ((v + m - 1) // m) * m


def _vmem_cap_bytes():
    """Per-generation scoped-VMEM ceiling (leave ~25% headroom for the compiler)."""
    try:
        cap = int(getattr(pltpu.get_tpu_info(), "vmem_capacity_bytes"))
    except Exception:
        cap = 64 * 1024 * 1024  # conservative fallback: v7x physical VMEM
    return (cap * 3) // 4


def _clamp_vmem(nbytes, cap):
    return int(min(max(int(nbytes), 16 * 1024 * 1024), cap))


def _row_outer(a_row, b_row):
    """outer[i, j] = a[0, i] * b[0, j] via a K=1 MXU contraction (no relayout)."""
    return jax.lax.dot_general(
        a_row, b_row, (((0,), (0,)), ((), ())),
        preferred_element_type=jnp.float32)


def _diag_row(mat):
    """diag(mat) as a (1, hp) row via a single masked cross-sublane reduce."""
    hp = mat.shape[0]
    sub = jax.lax.broadcasted_iota(jnp.int32, (hp, hp), 0)
    lane = jax.lax.broadcasted_iota(jnp.int32, (hp, hp), 1)
    return jnp.sum(jnp.where(sub == lane, mat, 0.0), axis=0, keepdims=True)


def _compute_scale(cov, std_row, h, eps, beta):
    """IsoBN scale row (1, hp) from cov (hp, hp) and std (1, hp).

    `h` = number of valid (unpadded) features; padded lanes carry exact zeros
    in cov/std and are excluded via the masked reciprocal (they contribute
    zeros to corr / E / new_E).  All math stays in lane-major (1, hp) rows;
    outer products use K=1 MXU contractions; gamma is taken over axis=0
    (cov is symmetric by construction in this kernel), so scale is born a row.
    """
    hp = cov.shape[0]
    lane_row = jax.lax.broadcasted_iota(jnp.int32, (1, hp), 1)
    valid_row = lane_row < h

    # O(hp) reciprocals + one K=1 MXU outer replace the hp*hp divide.
    inv_std = jnp.where(valid_row, 1.0 / std_row, 0.0)
    corr = jnp.clip(cov * _row_outer(inv_std, inv_std), -1.0, 1.0)

    gamma_row = jnp.sum(corr * corr, axis=0, keepdims=True) * (1.0 / h)
    denorm_row = gamma_row * std_row
    if beta == 0.5:
        scale_row = jax.lax.rsqrt(denorm_row + eps)            # EUP slot
    else:
        scale_row = jnp.exp(jnp.log(denorm_row + eps) * (-beta))

    diag = _diag_row(cov)                                      # padded entries = 0
    E = jnp.sum(diag, axis=1, keepdims=True)                   # (1, 1)
    new_E = jnp.sum(diag * scale_row * scale_row, axis=1, keepdims=True)
    m = jnp.sqrt(E / (new_E + eps))
    # NOTE: for hp >~ 2048 this finalize should be row-blocked to bound the
    # hp^2 temporaries; fine for typical hidden sizes.
    return scale_row * m


def _make_stats_kernel(n, h, tile_n, momentum, eps, beta):
    inv_n = 1.0 / float(n)
    momentum = float(momentum)
    ragged = (n % tile_n) != 0

    def kernel(x_ref, cov_ref, std_ref,
               new_cov_ref, new_std_ref, scale_ref, sumx_ref):
        i = pl.program_id(0)

        @pl.when(i == 0)
        def _init():
            sumx_ref[...] = jnp.zeros_like(sumx_ref)
            new_cov_ref[...] = jnp.zeros_like(new_cov_ref)     # x^T x accumulator

        x = x_ref[...]                                         # (tile_n, hp), input dtype
        if ragged:
            # Mask rows past n on the last (ragged) tile before accumulating.
            row = jax.lax.broadcasted_iota(jnp.int32, (tile_n, 1), 0) + i * tile_n
            x = jnp.where(row < n, x, jnp.zeros_like(x))

        sumx_ref[...] += jnp.sum(x.astype(jnp.float32), axis=0, keepdims=True)
        # Feed the MXU in the input dtype (native bf16 rate), f32 accumulation,
        # straight into the resident output block (no separate xxt scratch).
        new_cov_ref[...] += jax.lax.dot_general(
            x, x, (((0,), (0,)), ((), ())),
            preferred_element_type=jnp.float32)

        @pl.when(i == pl.num_programs(0) - 1)
        def _finalize():
            mean = sumx_ref[...] * inv_n                       # (1, hp)
            xxt = new_cov_ref[...]
            # per-feature sum(x^2) is diag(x^T x): no separate sumsq accumulator.
            var = jnp.maximum(_diag_row(xxt) * inv_n - mean * mean, 0.0)
            std_b = jnp.sqrt(var)                              # (1, hp)
            cov_b = xxt * inv_n - _row_outer(mean, mean)

            cov_old = cov_ref[...]
            std_old = std_ref[...]
            cov_new = cov_old + momentum * (cov_b - cov_old)
            std_new = std_old + momentum * (std_b - std_old)

            new_cov_ref[...] = cov_new
            new_std_ref[...] = std_new
            scale_ref[...] = _compute_scale(cov_new, std_new, h, eps, beta)

    return kernel


def _make_scale_kernel(h, eps, beta):
    def kernel(cov_ref, std_ref, scale_ref):
        scale_ref[...] = _compute_scale(cov_ref[...], std_ref[...], h, eps, beta)
    return kernel


def _apply_kernel(x_ref, scale_ref, out_ref):
    out_ref[...] = (x_ref[...].astype(jnp.float32)
                    * scale_ref[...]).astype(out_ref.dtype)


@functools.partial(
    jax.jit,
    static_argnames=("momentum", "eps", "beta", "training", "max_tile_rows"))
def isobn_forward(x, cov, std, *, momentum=0.05, eps=0.001, beta=0.5,
                  training=True, max_tile_rows=None):
    """Pallas IsoBN forward.

    Returns (output, new_cov, new_std); the latter two mirror the in-place
    running-statistics updates of the PyTorch module (returned unchanged when
    training=False).  `max_tile_rows` is a test hook to force small batch tiles.
    """
    n, h = x.shape
    momentum = float(momentum)
    eps = float(eps)
    beta = float(beta)

    itemsize = jnp.dtype(x.dtype).itemsize
    sub = max(8, 32 // itemsize)            # dtype sublane multiple (8/16/32)
    hp = _round_up(h, 128)                  # lane-dense feature axis
    cap = _vmem_cap_bytes()

    # Batch tile: target a few MiB of x per block for the memory-bound passes,
    # bounded by what VMEM leaves after the hp^2-resident buffers.  The batch
    # axis is NOT padded in the wrapper: ragged tiles are masked in-kernel and
    # ragged output writes are dropped by the pipeline.
    resident = 12 * hp * hp * 4 + 64 * hp * 4
    per_tile_budget = max(512 * 1024, min(4 * 1024 * 1024, (cap - resident) // 4))
    tile_rows = max(sub, per_tile_budget // (hp * itemsize))
    if max_tile_rows is not None:
        tile_rows = max(sub, min(tile_rows, max_tile_rows))
    if n <= tile_rows:
        tile_n = n                          # single full-batch tile
    else:
        tile_n = min(1024, (tile_rows // sub) * sub)
    num_tiles = pl.cdiv(n, tile_n)

    # Pad only the feature axis (and only if needed); padded features are exact
    # zeros through the statistics and masked out of corr/gamma.
    if hp != h:
        xp = jnp.zeros((n, hp), x.dtype).at[:, :h].set(x)
        covp = jnp.zeros((hp, hp), jnp.float32).at[:h, :h].set(
            cov.astype(jnp.float32))
        stdp = jnp.zeros((1, hp), jnp.float32).at[0, :h].set(
            std.astype(jnp.float32))
    else:
        xp = x
        covp = cov.astype(jnp.float32)
        stdp = std.astype(jnp.float32).reshape(1, h)

    if training:
        stats_vmem = _clamp_vmem(
            2 * tile_n * hp * itemsize + 14 * hp * hp * 4 + 64 * hp * 4, cap)
        new_cov_p, new_std_p, scale_p = pl.pallas_call(
            _make_stats_kernel(n, h, tile_n, momentum, eps, beta),
            grid=(num_tiles,),
            in_specs=[
                pl.BlockSpec((tile_n, hp), lambda i: (i, 0)),
                pl.BlockSpec((hp, hp), lambda i: (0, 0)),
                pl.BlockSpec((1, hp), lambda i: (0, 0)),
            ],
            out_specs=(
                pl.BlockSpec((hp, hp), lambda i: (0, 0)),
                pl.BlockSpec((1, hp), lambda i: (0, 0)),
                pl.BlockSpec((1, hp), lambda i: (0, 0)),
            ),
            out_shape=(
                jax.ShapeDtypeStruct((hp, hp), jnp.float32),
                jax.ShapeDtypeStruct((1, hp), jnp.float32),
                jax.ShapeDtypeStruct((1, hp), jnp.float32),
            ),
            scratch_shapes=[pltpu.VMEM((1, hp), jnp.float32)],   # sum(x)
            # Alias the running buffers: cov -> new_cov, std -> new_std.
            input_output_aliases={1: 0, 2: 1},
            compiler_params=pltpu.CompilerParams(
                dimension_semantics=("arbitrary",),
                vmem_limit_bytes=stats_vmem),
        )(xp, covp, stdp)
        new_cov = new_cov_p[:h, :h] if hp != h else new_cov_p
        new_std = new_std_p[0, :h]
    else:
        scale_vmem = _clamp_vmem(10 * hp * hp * 4 + 64 * hp * 4, cap)
        vmem = pl.BlockSpec(memory_space=pltpu.MemorySpace.VMEM)
        scale_p = pl.pallas_call(
            _make_scale_kernel(h, eps, beta),
            in_specs=[vmem, vmem],
            out_specs=vmem,
            out_shape=jax.ShapeDtypeStruct((1, hp), jnp.float32),
            compiler_params=pltpu.CompilerParams(vmem_limit_bytes=scale_vmem),
        )(covp, stdp)
        new_cov = cov
        new_std = std

    apply_vmem = _clamp_vmem(
        4 * tile_n * hp * itemsize + 16 * hp * 4 + 2 * 1024 * 1024, cap)
    out_p = pl.pallas_call(
        _apply_kernel,
        grid=(num_tiles,),
        in_specs=[
            pl.BlockSpec((tile_n, hp), lambda i: (i, 0)),
            pl.BlockSpec((1, hp), lambda i: (0, 0)),
        ],
        out_specs=pl.BlockSpec((tile_n, hp), lambda i: (i, 0)),
        out_shape=jax.ShapeDtypeStruct((n, hp), x.dtype),
        compiler_params=pltpu.CompilerParams(
            dimension_semantics=("parallel",),
            vmem_limit_bytes=apply_vmem),
    )(xp, scale_p)
    out = out_p[:, :h] if hp != h else out_p
    return out, new_cov, new_std


def _isobn_reference(x, cov0, std0, momentum=0.05, eps=0.001, beta=0.5,
                     training=True):
    """Pure-JAX transcription of the PyTorch forward, for verification."""
    if training:
        n = x.shape[0]
        mean = x.mean(axis=0)
        y = x - mean[None, :]
        std_b = jnp.sqrt((y ** 2).mean(axis=0))
        cov_b = y.T @ y / n
        cov = cov0 + momentum * (cov_b - cov0)
        std = std0 + momentum * (std_b - std0)
    else:
        cov, std = cov0, std0
    corr = jnp.clip(cov / jnp.outer(std, std), -1.0, 1.0)
    gamma = (corr ** 2).mean(axis=1)
    denorm = gamma * std
    scale = 1.0 / (denorm + eps) ** beta
    E = jnp.diag(cov).sum()
    new_E = (jnp.diag(cov) * scale ** 2).sum()
    m = (E / (new_E + eps)) ** 0.5
    scale = scale * m                      # PyTorch: scale *= m (was missing before)
    return x * scale[None, :], cov, std


if __name__ == "__main__":
    N, H = 8, 32  # batch, hidden_size

    key = jax.random.PRNGKey(0)
    x = jax.random.normal(key, (N, H), dtype=jnp.float32)

    # Deterministic buffer init, as in IsoBN.__init__ (zeros buffers).
    cov0 = jnp.zeros((H, H), dtype=jnp.float32)
    std0 = jnp.zeros((H,), dtype=jnp.float32)

    # Training step (updates the running stats).
    out, new_cov, new_std = isobn_forward(x, cov0, std0, training=True)
    jax.block_until_ready((out, new_cov, new_std))
    ref_out, ref_cov, ref_std = _isobn_reference(x, cov0, std0, training=True)
    assert jnp.allclose(out, ref_out, atol=1e-4, rtol=1e-4), "train output mismatch"
    assert jnp.allclose(new_cov, ref_cov, atol=1e-5, rtol=1e-4), "cov mismatch"
    assert jnp.allclose(new_std, ref_std, atol=1e-5, rtol=1e-4), "std mismatch"

    # Eval step (running stats frozen, only the rescale is applied).
    out_e, cov_e, std_e = isobn_forward(x, new_cov, new_std, training=False)
    jax.block_until_ready(out_e)
    ref_out_e, _, _ = _isobn_reference(x, ref_cov, ref_std, training=False)
    assert jnp.allclose(out_e, ref_out_e, atol=1e-4, rtol=1e-4), "eval output mismatch"
    assert jnp.allclose(cov_e, new_cov) and jnp.allclose(std_e, new_std)

    # Multi-tile / ragged-batch path (in-kernel row masking, no wrapper N-pad).
    N2 = 20
    x2 = jax.random.normal(jax.random.PRNGKey(1), (N2, H), dtype=jnp.float32)
    out2, cov2, std2 = isobn_forward(x2, cov0, std0, training=True,
                                     max_tile_rows=8)
    jax.block_until_ready((out2, cov2, std2))
    r_out2, r_cov2, r_std2 = _isobn_reference(x2, cov0, std0, training=True)
    assert jnp.allclose(out2, r_out2, atol=1e-4, rtol=1e-4), "ragged output mismatch"
    assert jnp.allclose(cov2, r_cov2, atol=1e-5, rtol=1e-4), "ragged cov mismatch"
    assert jnp.allclose(std2, r_std2, atol=1e-5, rtol=1e-4), "ragged std mismatch"

    print("KERNEL_OK")
</pallas_src>

<mosaic_0001>
module attributes {stable_mosaic.version = 11 : i64} {
  func.func @_apply_kernel(%arg0: i32, %arg1: memref<8x128xf32, #tpu.memory_space<vmem>>, %arg2: memref<1x128xf32, #tpu.memory_space<vmem>>, %arg3: memref<8x128xf32, #tpu.memory_space<vmem>>) attributes {dimension_semantics = [#tpu.dimension_semantics<parallel>], iteration_bounds = array<i64: 1>, scalar_prefetch = 0 : i64, scratch_operands = 0 : i64, tpu.core_type = #tpu.core_type<tc>, window_params = [{transform_indices = @transform_0, window_bounds = array<i64: 8, 128>}, {pipeline_mode = #tpu.pipeline_mode<synchronous>, transform_indices = @transform_1, window_bounds = array<i64: 1, 128>}, {transform_indices = @transform_2, window_bounds = array<i64: 8, 128>}]} {
    %c0 = arith.constant 0 : index
    %c0_0 = arith.constant 0 : index
    %0 = vector.load %arg1[%c0, %c0_0] : memref<8x128xf32, #tpu.memory_space<vmem>>, vector<8x128xf32>
    %c0_1 = arith.constant 0 : index
    %c0_2 = arith.constant 0 : index
    %1 = vector.load %arg2[%c0_1, %c0_2] : memref<1x128xf32, #tpu.memory_space<vmem>>, vector<1x128xf32>
    %2 = vector.broadcast %1 : vector<1x128xf32> to vector<8x128xf32>
    %3 = arith.mulf %0, %2 : vector<8x128xf32>
    %c0_3 = arith.constant 0 : index
    %c0_4 = arith.constant 0 : index
    %4 = vector.load %arg3[%c0_3, %c0_4] : memref<8x128xf32, #tpu.memory_space<vmem>>, vector<8x128xf32>
    tpu.vector_store %arg3[%c0_3, %c0_4], %3 {strides = array<i32>} : memref<8x128xf32, #tpu.memory_space<vmem>>, vector<8x128xf32>,
    return
  }
  func.func @transform_0(%arg0: i32) -> (i32, i32) {
    %c0_i32 = arith.constant 0 : i32
    %c0_i32_0 = arith.constant 0 : i32
    return %arg0, %c0_i32 : i32, i32
  }
  func.func @transform_1(%arg0: i32) -> (i32, i32) {
    %c0_i32 = arith.constant 0 : i32
    %c0_i32_0 = arith.constant 0 : i32
    %c0_i32_1 = arith.constant 0 : i32
    return %c0_i32, %c0_i32_0 : i32, i32
  }
  func.func @transform_2(%arg0: i32) -> (i32, i32) {
    %c0_i32 = arith.constant 0 : i32
    %c0_i32_0 = arith.constant 0 : i32
    return %arg0, %c0_i32 : i32, i32
  }
}

module attributes {stable_mosaic.version = 11 : i64} {
  func.func @kernel(%arg0: i32, %arg1: memref<8x128xf32, #tpu.memory_space<vmem>>, %arg2: memref<128x128xf32, #tpu.memory_space<vmem>>, %arg3: memref<1x128xf32, #tpu.memory_space<vmem>>, %arg4: memref<128x128xf32, #tpu.memory_space<vmem>>, %arg5: memref<1x128xf32, #tpu.memory_space<vmem>>, %arg6: memref<1x128xf32, #tpu.memory_space<vmem>>, %arg7: memref<1x128xf32, #tpu.memory_space<vmem>>) attributes {dimension_semantics = [#tpu.dimension_semantics<arbitrary>], iteration_bounds = array<i64: 1>, scalar_prefetch = 0 : i64, scratch_operands = 1 : i64, tpu.core_type = #tpu.core_type<tc>, window_params = [{transform_indices = @transform_0, window_bounds = array<i64: 8, 128>}, {pipeline_mode = #tpu.pipeline_mode<synchronous>, transform_indices = @transform_1, window_bounds = array<i64: 128, 128>}, {pipeline_mode = #tpu.pipeline_mode<synchronous>, transform_indices = @transform_2, window_bounds = array<i64: 1, 128>}, {pipeline_mode = #tpu.pipeline_mode<synchronous>, transform_indices = @transform_3, window_bounds = array<i64: 128, 128>}, {pipeline_mode = #tpu.pipeline_mode<synchronous>, transform_indices = @transform_4, window_bounds = array<i64: 1, 128>}, {pipeline_mode = #tpu.pipeline_mode<synchronous>, transform_indices = @transform_5, window_bounds = array<i64: 1, 128>}]} {
    %c0_i32 = arith.constant 0 : i32
    %0 = arith.cmpi eq, %arg0, %c0_i32 : i32
    %1 = arith.extui %0 : i1 to i32
    %c0_i32_0 = arith.constant 0 : i32
    %2 = arith.cmpi ne, %1, %c0_i32_0 : i32
    scf.if %2 {
      %cst_13 = arith.constant 0.000000e+00 : f32
      %16 = vector.broadcast %cst_13 : f32 to vector<1x128xf32>
      %c0_14 = arith.constant 0 : index
      %c0_15 = arith.constant 0 : index
      %17 = vector.load %arg7[%c0_14, %c0_15] : memref<1x128xf32, #tpu.memory_space<vmem>>, vector<1x128xf32>
      tpu.vector_store %arg7[%c0_14, %c0_15], %16 {strides = array<i32>} : memref<1x128xf32, #tpu.memory_space<vmem>>, vector<1x128xf32>,
      %cst_16 = arith.constant 0.000000e+00 : f32
      %18 = vector.broadcast %cst_16 : f32 to vector<128x128xf32>
      %c0_17 = arith.constant 0 : index
      %c0_18 = arith.constant 0 : index
      %19 = vector.load %arg4[%c0_17, %c0_18] : memref<128x128xf32, #tpu.memory_space<vmem>>, vector<128x128xf32>
      tpu.vector_store %arg4[%c0_17, %c0_18], %18 {strides = array<i32>} : memref<128x128xf32, #tpu.memory_space<vmem>>, vector<128x128xf32>,
    } else {
    }
    %c0 = arith.constant 0 : index
    %c0_1 = arith.constant 0 : index
    %3 = vector.load %arg1[%c0, %c0_1] : memref<8x128xf32, #tpu.memory_space<vmem>>, vector<8x128xf32>
    %c0_2 = arith.constant 0 : index
    %c0_3 = arith.constant 0 : index
    %4 = vector.load %arg7[%c0_2, %c0_3] : memref<1x128xf32, #tpu.memory_space<vmem>>, vector<1x128xf32>
    %cst = arith.constant dense<0.000000e+00> : vector<128xf32>
    %5 = vector.multi_reduction <add>, %3, %cst [0] : vector<8x128xf32> to vector<128xf32>
    %6 = vector.shape_cast %5 : vector<128xf32> to vector<1x128xf32>
    %7 = arith.addf %4, %6 : vector<1x128xf32>
    %c0_4 = arith.constant 0 : index
    %c0_5 = arith.constant 0 : index
    %8 = vector.load %arg7[%c0_4, %c0_5] : memref<1x128xf32, #tpu.memory_space<vmem>>, vector<1x128xf32>
    tpu.vector_store %arg7[%c0_4, %c0_5], %7 {strides = array<i32>} : memref<1x128xf32, #tpu.memory_space<vmem>>, vector<1x128xf32>,
    %c0_6 = arith.constant 0 : index
    %c0_7 = arith.constant 0 : index
    %9 = vector.load %arg4[%c0_6, %c0_7] : memref<128x128xf32, #tpu.memory_space<vmem>>, vector<128x128xf32>
    %cst_8 = arith.constant dense<0.000000e+00> : vector<128x128xf32>
    %10 = tpu.matmul %3, %3, %cst_8 {dimension_numbers = #tpu.dot_dimension_numbers<[0], [0], [1], [1], [0, 1, 1, 1], [], []>} : vector<8x128xf32>, vector<8x128xf32>, vector<128x128xf32> -> vector<128x128xf32>
    %11 = arith.addf %9, %10 : vector<128x128xf32>
    %c0_9 = arith.constant 0 : index
    %c0_10 = arith.constant 0 : index
    %12 = vector.load %arg4[%c0_9, %c0_10] : memref<128x128xf32, #tpu.memory_space<vmem>>, vector<128x128xf32>
    tpu.vector_store %arg4[%c0_9, %c0_10], %11 {strides = array<i32>} : memref<128x128xf32, #tpu.memory_space<vmem>>, vector<128x128xf32>,
    %c0_i32_11 = arith.constant 0 : i32
    %13 = arith.cmpi eq, %arg0, %c0_i32_11 : i32
    %14 = arith.extui %13 : i1 to i32
    %c0_i32_12 = arith.constant 0 : i32
    %15 = arith.cmpi ne, %14, %c0_i32_12 : i32
    scf.if %15 {
      %c0_13 = arith.constant 0 : index
      %c0_14 = arith.constant 0 : index
      %16 = vector.load %arg7[%c0_13, %c0_14] : memref<1x128xf32, #tpu.memory_space<vmem>>, vector<1x128xf32>
      %cst_15 = arith.constant 1.250000e-01 : f32
      %17 = vector.broadcast %cst_15 : f32 to vector<1x128xf32>
      %18 = arith.mulf %16, %17 : vector<1x128xf32>
      %c0_16 = arith.constant 0 : index
      %c0_17 = arith.constant 0 : index
      %19 = vector.load %arg4[%c0_16, %c0_17] : memref<128x128xf32, #tpu.memory_space<vmem>>, vector<128x128xf32>
      %20 = tpu.iota {dimensions = array<i32: 0>} : vector<128x128xi32>
      %21 = tpu.iota {dimensions = array<i32: 1>} : vector<128x128xi32>
      %22 = arith.cmpi eq, %20, %21 : vector<128x128xi32>
      %cst_18 = arith.constant 0.000000e+00 : f32
      %23 = vector.broadcast %cst_18 : f32 to vector<128x128xf32>
      %24 = arith.select %22, %19, %23 : vector<128x128xi1>, vector<128x128xf32>
      %cst_19 = arith.constant dense<0.000000e+00> : vector<128xf32>
      %25 = vector.multi_reduction <add>, %24, %cst_19 [0] : vector<128x128xf32> to vector<128xf32>
      %26 = vector.shape_cast %25 : vector<128xf32> to vector<1x128xf32>
      %cst_20 = arith.constant 1.250000e-01 : f32
      %27 = vector.broadcast %cst_20 : f32 to vector<1x128xf32>
      %28 = arith.mulf %26, %27 : vector<1x128xf32>
      %29 = arith.mulf %18, %18 : vector<1x128xf32>
      %30 = arith.subf %28, %29 : vector<1x128xf32>
      %cst_21 = arith.constant 0.000000e+00 : f32
      %31 = vector.broadcast %cst_21 : f32 to vector<1x128xf32>
      %32 = arith.maximumf %30, %31 : vector<1x128xf32>
      %33 = math.sqrt %32 : vector<1x128xf32>
      %cst_22 = arith.constant 1.250000e-01 : f32
      %34 = vector.broadcast %cst_22 : f32 to vector<128x128xf32>
      %35 = arith.mulf %19, %34 : vector<128x128xf32>
      %cst_23 = arith.constant dense<0.000000e+00> : vector<128x128xf32>
      %36 = tpu.matmul %18, %18, %cst_23 {dimension_numbers = #tpu.dot_dimension_numbers<[0], [0], [1], [1], [0, 1, 1, 1], [], []>} : vector<1x128xf32>, vector<1x128xf32>, vector<128x128xf32> -> vector<128x128xf32>
      %37 = arith.subf %35, %36 : vector<128x128xf32>
      %c0_24 = arith.constant 0 : index
      %c0_25 = arith.constant 0 : index
      %38 = vector.load %arg2[%c0_24, %c0_25] : memref<128x128xf32, #tpu.memory_space<vmem>>, vector<128x128xf32>
      %c0_26 = arith.constant 0 : index
      %c0_27 = arith.constant 0 : index
      %39 = vector.load %arg3[%c0_26, %c0_27] : memref<1x128xf32, #tpu.memory_space<vmem>>, vector<1x128xf32>
      %40 = arith.subf %37, %38 : vector<128x128xf32>
      %cst_28 = arith.constant 5.000000e-02 : f32
      %41 = vector.broadcast %cst_28 : f32 to vector<128x128xf32>
      %42 = arith.mulf %41, %40 : vector<128x128xf32>
      %43 = arith.addf %38, %42 : vector<128x128xf32>
      %44 = arith.subf %33, %39 : vector<1x128xf32>
      %cst_29 = arith.constant 5.000000e-02 : f32
      %45 = vector.broadcast %cst_29 : f32 to vector<1x128xf32>
      %46 = arith.mulf %45, %44 : vector<1x128xf32>
      %47 = arith.addf %39, %46 : vector<1x128xf32>
      %c0_30 = arith.constant 0 : index
      %c0_31 = arith.constant 0 : index
      %48 = vector.load %arg4[%c0_30, %c0_31] : memref<128x128xf32, #tpu.memory_space<vmem>>, vector<128x128xf32>
      tpu.vector_store %arg4[%c0_30, %c0_31], %43 {strides = array<i32>} : memref<128x128xf32, #tpu.memory_space<vmem>>, vector<128x128xf32>,
      %c0_32 = arith.constant 0 : index
      %c0_33 = arith.constant 0 : index
      %49 = vector.load %arg5[%c0_32, %c0_33] : memref<1x128xf32, #tpu.memory_space<vmem>>, vector<1x128xf32>
      tpu.vector_store %arg5[%c0_32, %c0_33], %47 {strides = array<i32>} : memref<1x128xf32, #tpu.memory_space<vmem>>, vector<1x128xf32>,
      %50 = tpu.iota {dimensions = array<i32: 1>} : vector<1x128xi32>
      %c32_i32 = arith.constant 32 : i32
      %51 = vector.broadcast %c32_i32 : i32 to vector<1x128xi32>
      %52 = arith.cmpi slt, %50, %51 : vector<1x128xi32>
      %cst_34 = arith.constant 1.000000e+00 : f32
      %53 = vector.broadcast %cst_34 : f32 to vector<1x128xf32>
      %54 = arith.divf %53, %47 : vector<1x128xf32>
      %cst_35 = arith.constant 0.000000e+00 : f32
      %55 = vector.broadcast %cst_35 : f32 to vector<1x128xf32>
      %56 = arith.select %52, %54, %55 : vector<1x128xi1>, vector<1x128xf32>
      %cst_36 = arith.constant dense<0.000000e+00> : vector<128x128xf32>
      %57 = tpu.matmul %56, %56, %cst_36 {dimension_numbers = #tpu.dot_dimension_numbers<[0], [0], [1], [1], [0, 1, 1, 1], [], []>} : vector<1x128xf32>, vector<1x128xf32>, vector<128x128xf32> -> vector<128x128xf32>
      %58 = arith.mulf %43, %57 : vector<128x128xf32>
      %cst_37 = arith.constant -1.000000e+00 : f32
      %cst_38 = arith.constant 1.000000e+00 : f32
      %59 = vector.broadcast %cst_37 : f32 to vector<128x128xf32>
      %60 = arith.maximumf %59, %58 : vector<128x128xf32>
      %61 = vector.broadcast %cst_38 : f32 to vector<128x128xf32>
      %62 = arith.minimumf %61, %60 : vector<128x128xf32>
      %63 = arith.mulf %62, %62 : vector<128x128xf32>
      %cst_39 = arith.constant dense<0.000000e+00> : vector<128xf32>
      %64 = vector.multi_reduction <add>, %63, %cst_39 [0] : vector<128x128xf32> to vector<128xf32>
      %65 = vector.shape_cast %64 : vector<128xf32> to vector<1x128xf32>
      %cst_40 = arith.constant 3.125000e-02 : f32
      %66 = vector.broadcast %cst_40 : f32 to vector<1x128xf32>
      %67 = arith.mulf %65, %66 : vector<1x128xf32>
      %68 = arith.mulf %67, %47 : vector<1x128xf32>
      %cst_41 = arith.constant 1.000000e-03 : f32
      %69 = vector.broadcast %cst_41 : f32 to vector<1x128xf32>
      %70 = arith.addf %68, %69 : vector<1x128xf32>
      %71 = math.rsqrt %70 : vector<1x128xf32>
      %72 = tpu.iota {dimensions = array<i32: 0>} : vector<128x128xi32>
      %73 = tpu.iota {dimensions = array<i32: 1>} : vector<128x128xi32>
      %74 = arith.cmpi eq, %72, %73 : vector<128x128xi32>
      %cst_42 = arith.constant 0.000000e+00 : f32
      %75 = vector.broadcast %cst_42 : f32 to vector<128x128xf32>
      %76 = arith.select %74, %43, %75 : vector<128x128xi1>, vector<128x128xf32>
      %cst_43 = arith.constant dense<0.000000e+00> : vector<128xf32>
      %77 = vector.multi_reduction <add>, %76, %cst_43 [0] : vector<128x128xf32> to vector<128xf32>
      %78 = vector.shape_cast %77 : vector<128xf32> to vector<1x128xf32>
      %cst_44 = arith.constant dense<0.000000e+00> : vector<1xf32>
      %79 = vector.multi_reduction <add>, %78, %cst_44 [1] : vector<1x128xf32> to vector<1xf32>
      %80 = vector.shape_cast %79 : vector<1xf32> to vector<1x1xf32>
      %81 = arith.mulf %78, %71 : vector<1x128xf32>
      %82 = arith.mulf %81, %71 : vector<1x128xf32>
      %cst_45 = arith.constant dense<0.000000e+00> : vector<1xf32>
      %83 = vector.multi_reduction <add>, %82, %cst_45 [1] : vector<1x128xf32> to vector<1xf32>
      %84 = vector.shape_cast %83 : vector<1xf32> to vector<1x1xf32>
      %cst_46 = arith.constant 1.000000e-03 : f32
      %85 = vector.broadcast %cst_46 : f32 to vector<1x1xf32>
      %86 = arith.addf %84, %85 : vector<1x1xf32>
      %87 = arith.divf %80, %86 : vector<1x1xf32>
      %88 = math.sqrt %87 : vector<1x1xf32>
      %89 = vector.broadcast %88 : vector<1x1xf32> to vector<1x128xf32>
      %90 = arith.mulf %71, %89 : vector<1x128xf32>
      %c0_47 = arith.constant 0 : index
      %c0_48 = arith.constant 0 : index
      %91 = vector.load %arg6[%c0_47, %c0_48] : memref<1x128xf32, #tpu.memory_space<vmem>>, vector<1x128xf32>
      tpu.vector_store %arg6[%c0_47, %c0_48], %90 {strides = array<i32>} : memref<1x128xf32, #tpu.memory_space<vmem>>, vector<1x128xf32>,
    } else {
    }
    return
  }
  func.func @transform_0(%arg0: i32) -> (i32, i32) {
    %c0_i32 = arith.constant 0 : i32
    %c0_i32_0 = arith.constant 0 : i32
    return %arg0, %c0_i32 : i32, i32
  }
  func.func @transform_1(%arg0: i32) -> (i32, i32) {
    %c0_i32 = arith.constant 0 : i32
    %c0_i32_0 = arith.constant 0 : i32
    %c0_i32_1 = arith.constant 0 : i32
    return %c0_i32, %c0_i32_0 : i32, i32
  }
  func.func @transform_2(%arg0: i32) -> (i32, i32) {
    %c0_i32 = arith.constant 0 : i32
    %c0_i32_0 = arith.constant 0 : i32
    %c0_i32_1 = arith.constant 0 : i32
    return %c0_i32, %c0_i32_0 : i32, i32
  }
  func.func @transform_3(%arg0: i32) -> (i32, i32) {
    %c0_i32 = arith.constant 0 : i32
    %c0_i32_0 = arith.constant 0 : i32
    %c0_i32_1 = arith.constant 0 : i32
    return %c0_i32, %c0_i32_0 : i32, i32
  }
  func.func @transform_4(%arg0: i32) -> (i32, i32) {
    %c0_i32 = arith.constant 0 : i32
    %c0_i32_0 = arith.constant 0 : i32
    %c0_i32_1 = arith.constant 0 : i32
    return %c0_i32, %c0_i32_0 : i32, i32
  }
  func.func @transform_5(%arg0: i32) -> (i32, i32) {
    %c0_i32 = arith.constant 0 : i32
    %c0_i32_0 = arith.constant 0 : i32
    %c0_i32_1 = arith.constant 0 : i32
    return %c0_i32, %c0_i32_0 : i32, i32
  }
}

</mosaic_0001>

<bundles_post_ra>
// kernel: isobn_forward.3
= control target key start
LH: loop header
LB: loop body
LE: loop exit
PB: predicated region body
PF: predicated region fallthrough
CT: control target
= control target key end

     0   :  { %s96_s0 = inlined_call_operand.vmem [shape: f32[8,128], index: 0, kind: input, shape index: {}]   ;;  %s97_s1 = inlined_call_operand.vmem [shape: f32[1,128], index: 1, kind: input, shape index: {}]   ;;  %s98_s2 = inlined_call_operand.hbm [shape: f32[8,128], index: 2, kind: output, shape index: {}]  }
   0x1   :  { %v12_v0 = vld [vmem:[%s96_s0] sm:$0xff] }
   0x2   :  { %v36_v1 = vld [vmem:[%s97_s1] ss:$0 sm:$0xff] }
   0x3   :  { %7 = vsyncpa [#allocation3], 0  ;;  %v20_v2 = vmul.f32 %v36_v1, %v12_v0  ;;  %s62_s13 = smov [#allocation2]  }
   0x4   :  { %s28_s14 = sshll.u32 %s62_s13, 4  ;;  %s29_s14 = int_to_ptr.vmem [resolvable:$true] %s28_s14 }
   0x5   :  { %21 = vst [vmem:[#allocation2] sm:$0xff] %v20_v2  ;;  %s38_s15 = scalar_lea.vmem %s29_s14, 128  ;;  %p43_p1 = scmp.lt.s32.totalorder %s29_s14, %s29_s14 }
   0x6   :  { %p39_p0 = scmp.ne.s32.totalorder %s29_s14, %s38_s15  ;;  %p44_p2 = scmp.lt.s32.totalorder %s38_s15, %s38_s15 }
   0x8   :  { %p45_p3 = por %p44_p2, %p43_p1 }
   0xa   :  { %p46_p4 = pnand %p45_p3, %p39_p0 }
   0xc   :  { %49 = shalt.err (!%p46_p4)
}
   0xd   :  { %s50_s0 = scalar_lea.hbm %s98_s2, 128 }
   0xe   :  { %p51_p5 = scmp.ne.s32.totalorder %s98_s2, %s50_s0  ;;  %p54_p6 = scmp.lt.u32.totalorder %s50_s0, %s98_s2 }
  0x10   :  { %p56_p7 = pnand %p54_p6, %p51_p5 }
  0x12   :  { %59 = shalt.err (!%p56_p7)
}
  0x13   :  { %31 = dma.vmem_to_hbm [thread:$0]  %s29_s14, 128, %s98_s2, [#allocation3]  }
  0x14   :  { %60 = dma.done.wait [#allocation3], 128  }
  0x15   :  { %61 = vsyncadd [#allocation3], 4294967168 }
  0x16   :  { %35 = vsyncpa [#allocation3], 1 }

// kernel: isobn_forward.2
= control target key start
LH: loop header
LB: loop body
LE: loop exit
PB: predicated region body
PF: predicated region fallthrough
CT: control target
= control target key end

     0   :  { %v1370_v0 = vmov 0.0   ;;  %vm523_vm0 = vcmask 1040384   ;;  %vm96_vm1 = vcmask 64512   ;;  %vm1970_vm2 = vcmask 7168   ;;  %s1964_s0 = inlined_call_operand.vmem [shape: f32[8,128], index: 0, kind: input, shape index: {}]   ;;  %s1965_s3 = inlined_call_operand.vmem [shape: f32[128,128], index: 3, kind: output, shape index: {0}, may-alias: {1,3}]   ;;  %s1966_s1 = inlined_call_operand.vmem [shape: f32[128,128], index: 1, kind: input, shape index: {}, may-alias: {1,3}]   ;;  %s1967_s2 = inlined_call_operand.vmem [shape: f32[1,128], index: 2, kind: input, shape index: {}, may-alias: {2,4}]   ;;  %s1968_s4 = inlined_call_operand.vmem [shape: f32[1,128], index: 4, kind: output, shape index: {1}, may-alias: {2,4}]   ;;  %s1969_s5 = inlined_call_operand.vmem [shape: f32[1,128], index: 5, kind: output, shape index: {2}]  }
   0x1   :  { %21 = vst [vmem:[#allocation2] sm:$0x1] %v1370_v0  ;;  %v38_v1 = vld [vmem:[%s1964_s0] sm:$0xff]  ;;  %v343_v44 = vlaneseq }
   0x2   :  { %64 = vxpose.xlu0.b32.start.end [1/1] (short) %v38_v1, 128  ;;  %v40_v2 = vrot.slane %v38_v1, 4  ;;  %1279 = vmatprep.subr.mxu0 %v38_v1 }
   0x3   :  { %1280 = vmatpush3.msra.mxu0 %v38_v1  ;;  %1357 = vmatprep.subr.mxu1 %v38_v1  ;;  %v1443_v45 = vshrl.u32 %v343_v44, 7  ;;  %v1448_v47 = vand.u32 127, %v343_v44 }
   0x4   :  { %v41_v3 = vadd.f32 %v40_v2, %v38_v1  ;;  %1358 = vmatpush3.msra.mxu1 %v38_v1 }
   0x5   :  { %v1446_v46 = vadd.s32 8, %v1443_v45  ;;  %vm362_vm4 = vcmp.eq.s32.totalorder %v1443_v45, %v1448_v47  ;;  %v1475_v53 = vadd.s32 16, %v1443_v45  ;;  %v1478_v54 = vadd.s32 24, %v1443_v45 }
   0x6   :  { %v42_v4 = vrot.slane %v41_v3, 2  ;;  %v1501_v59 = vadd.s32 32, %v1443_v45  ;;  %v1508_v61 = vadd.s32 40, %v1443_v45 }
   0x7   :  { %vm363_vm3 = vcmp.eq.s32.totalorder %v1446_v46, %v1448_v47  ;;  %vm364_vm5 = vcmp.eq.s32.totalorder %v1475_v53, %v1448_v47  ;;  %vm365_vm6 = vcmp.eq.s32.totalorder %v1478_v54, %v1448_v47 }
   0x8   :  { %v43_v5 = vadd.f32 %v42_v4, %v41_v3  ;;  %v39_v7 = vld [vmem:[#allocation2] sm:$0x1]  ;;  %vm366_vm7 = vcmp.eq.s32.totalorder %v1501_v59, %v1448_v47  ;;  %vm367_vm8 = vcmp.eq.s32.totalorder %v1508_v61, %v1448_v47  ;;  %v1531_v3 = vadd.s32 48, %v1443_v45 }
   0xa   :  { %v44_v6 = vrot.slane %v43_v5, 1  ;;  %vm368_vm9 = vcmp.eq.s32.totalorder %v1531_v3, %v1448_v47 }
   0xc   :  { %v45_v8 = vadd.f32 %v44_v6, %v43_v5  ;;  %v1538_v5 = vadd.s32 56, %v1443_v45 }
   0xe   :  { %v46_v9 = vadd.f32 %v45_v8, %v39_v7  ;;  %vm369_vm10 = vcmp.eq.s32.totalorder %v1538_v5, %v1448_v47 }
  0x10   :  { %47 = vst [vmem:[#allocation2] sm:$0x1] %v46_v9 }
  0x17   :  { %v325_v10 = vld [vmem:[#allocation2] sm:$0x1] }
  0x18   :  { %v1404_v11 = vmul.f32 0.125, %v325_v10 }
  0x1a   :  { %1305 = vmatprep.subr.msk.mxu1 %vm523_vm0, %v1404_v11 }
  0x3f   :  { %442 = vxpose.xlu0.b32.start.end [1/1] (short) %v1404_v11, 128 }
  0x82   :  { %v80_v12 = vpop.trf.xlu0 }
  0x83   :  { %1281 = vmatprep.mubr.msk.f32.mxu0 %vm96_vm1, %v80_v12  ;;  %v1561_v12 = vadd.s32 64, %v1443_v45 }
  0x85   :  { %vm370_vm11 = vcmp.eq.s32.totalorder %v1561_v12, %v1448_v47 }
  0x86   :  { %v81_v13 = vpop.trf.xlu0 }
  0x87   :  { %1282 = vmatmul.mubr.msk.f32.vlgmr.msra.gmra.mrb[0].mxu0 %vm96_vm1, %v81_v13 }
  0x8a   :  { %v82_v14 = vpop.trf.xlu0 }
  0x8b   :  { %1284 = vmatprep.mubr.msk.f32.mxu0 %vm96_vm1, %v82_v14  ;;  %v1568_v14 = vadd.s32 72, %v1443_v45 }
  0x8d   :  { %vm371_vm12 = vcmp.eq.s32.totalorder %v1568_v14, %v1448_v47 }
  0x8e   :  { %v83_v15 = vpop.trf.xlu0 }
  0x8f   :  { %1285 = vmatmul.mubr.msk.f32.gmra.mrb[2].mxu0 %vm96_vm1, %v83_v15 }
  0x92   :  { %v84_v16 = vpop.trf.xlu0 }
  0x93   :  { %1287 = vmatprep.mubr.msk.f32.mxu0 %vm96_vm1, %v84_v16 }
  0x96   :  { %v85_v17 = vpop.trf.xlu0 }
  0x97   :  { %1288 = vmatmul.mubr.msk.f32.gmra.mrb[4].mxu0 %vm96_vm1, %v85_v17 }
  0x9a   :  { %v86_v18 = vpop.trf.xlu0 }
  0x9b   :  { %1290 = vmatprep.mubr.msk.f32.mxu0 %vm96_vm1, %v86_v18 }
  0x9e   :  { %v87_v19 = vpop.trf.xlu0 }
  0x9f   :  { %1291 = vmatmul.mubr.msk.f32.gmra.mrb[6].mxu0 %vm96_vm1, %v87_v19 }
  0xa2   :  { %v88_v20 = vpop.trf.xlu0 }
  0xa3   :  { %1293 = vmatprep.mubr.msk.f32.mxu1 %vm96_vm1, %v88_v20  ;;  %v1591_v20 = vadd.s32 80, %v1443_v45 }
  0xa5   :  { %vm372_vm13 = vcmp.eq.s32.totalorder %v1591_v20, %v1448_v47 }
  0xa6   :  { %v89_v21 = vpop.trf.xlu0 }
  0xa7   :  { %1294 = vmatmul.mubr.msk.f32.vlgmr.msra.gmra.mrb[0].mxu1 %vm96_vm1, %v89_v21 }
  0xa8   :  { %1306 = vmatpush3.msk.msra.mxu1 %vm523_vm0, %v1404_v11 }
  0xaa   :  { %v90_v22 = vpop.trf.xlu0 }
  0xab   :  { %1296 = vmatprep.mubr.msk.f32.mxu1 %vm96_vm1, %v90_v22  ;;  %v1598_v22 = vadd.s32 88, %v1443_v45 }
  0xad   :  { %vm373_vm14 = vcmp.eq.s32.totalorder %v1598_v22, %v1448_v47 }
  0xae   :  { %v91_v23 = vpop.trf.xlu0 }
  0xaf   :  { %1297 = vmatmul.mubr.msk.f32.gmra.mrb[2].mxu1 %vm96_vm1, %v91_v23 }
  0xb2   :  { %v92_v24 = vpop.trf.xlu0 }
  0xb3   :  { %1299 = vmatprep.mubr.msk.f32.mxu1 %vm96_vm1, %v92_v24 }
  0xb6   :  { %v93_v25 = vpop.trf.xlu0 }
  0xb7   :  { %1300 = vmatmul.mubr.msk.f32.gmra.mrb[4].mxu1 %vm96_vm1, %v93_v25 }
  0xba   :  { %v94_v26 = vpop.trf.xlu0 }
  0xbb   :  { %1302 = vmatprep.mubr.msk.f32.mxu1 %vm96_vm1, %v94_v26 }
  0xbe   :  { %v95_v27 = vpop.trf.xlu0 }
  0xbf   :  { %1303 = vmatmul.mubr.msk.f32.gmra.mrb[6].mxu1 %vm96_vm1, %v95_v27 }
  0xc2   :  { %v458_v28 = vpop.trf.xlu0 }
  0xc3   :  { %1307 = vmatprep.mubr.msk.f32.mxu1 %vm1970_vm2, %v458_v28  ;;  %v1621_v28 = vadd.s32 96, %v1443_v45 }
  0xc5   :  { %vm1971_vm15 = vcmp.eq.s32.totalorder %v1621_v28, %v1448_v47 }
  0xc6   :  { %v459_v29 = vpop.trf.xlu0 }
  0xc7   :  { %1308 = vmatmul.mubr.msk.f32.vlgmr.msra.gmra.mrb[8].mxu1 %vm1970_vm2, %v459_v29 }
  0xca   :  { %v460_v30 = vpop.trf.xlu0 }
  0xcb   :  { %1310 = vmatprep.mubr.msk.f32.mxu1 %vm1970_vm2, %v460_v30  ;;  %v1628_v30 = vadd.s32 104, %v1443_v45 }
  0xcd   :  { %vm375_vm1 = vcmp.eq.s32.totalorder %v1628_v30, %v1448_v47 }
  0xce   :  { %v461_v31 = vpop.trf.xlu0 }
  0xcf   :  { %1311 = vmatmul.mubr.msk.f32.gmra.mrb[10].mxu1 %vm1970_vm2, %v461_v31 }
  0xd2   :  { %v462_v32 = vpop.trf.xlu0 }
  0xd3   :  { %1313 = vmatprep.mubr.msk.f32.mxu1 %vm1970_vm2, %v462_v32 }
  0xd6   :  { %v463_v33 = vpop.trf.xlu0 }
  0xd7   :  { %1314 = vmatmul.mubr.msk.f32.gmra.mrb[12].mxu1 %vm1970_vm2, %v463_v33 }
  0xda   :  { %v464_v34 = vpop.trf.xlu0 }
  0xdb   :  { %1316 = vmatprep.mubr.msk.f32.mxu1 %vm1970_vm2, %v464_v34 }
  0xde   :  { %v465_v35 = vpop.trf.xlu0 }
  0xdf   :  { %1317 = vmatmul.mubr.msk.f32.gmra.mrb[14].mxu1 %vm1970_vm2, %v465_v35 }
  0xe2   :  { %v466_v36 = vpop.trf.xlu0 }
  0xe3   :  { %1319 = vmatprep.mubr.msk.f32.mxu1 %vm1970_vm2, %v466_v36  ;;  %v1651_v36 = vadd.s32 112, %v1443_v45 }
  0xe6   :  { %v467_v37 = vpop.trf.xlu0 }
  0xe7   :  { %1320 = vmatmul.mubr.msk.f32.gmra.mrb[16].mxu1 %vm1970_vm2, %v467_v37 }
  0xea   :  { %v468_v38 = vpop.trf.xlu0 }
  0xeb   :  { %1322 = vmatprep.mubr.msk.f32.mxu1 %vm1970_vm2, %v468_v38  ;;  %v1658_v38 = vadd.s32 120, %v1443_v45 }
  0xee   :  { %v469_v39 = vpop.trf.xlu0 }
  0xef   :  { %1323 = vmatmul.mubr.msk.f32.gmra.mrb[18].mxu1 %vm1970_vm2, %v469_v39 }
  0xf2   :  { %v470_v40 = vpop.trf.xlu0 }
  0xf3   :  { %1325 = vmatprep.mubr.msk.f32.mxu1 %vm1970_vm2, %v470_v40 }
  0xf6   :  { %v471_v41 = vpop.trf.xlu0 }
  0xf7   :  { %1326 = vmatmul.mubr.msk.f32.gmra.mrb[20].mxu1 %vm1970_vm2, %v471_v41 }
  0xfa   :  { %v472_v42 = vpop.trf.xlu0 }
  0xfb   :  { %1328 = vmatprep.mubr.msk.f32.mxu1 %vm1970_vm2, %v472_v42 }
  0xfe   :  { %v473_v43 = vpop.trf.xlu0 }
  0xff   :  { %1329 = vmatmul.mubr.msk.f32.gmra.mrb[22].mxu1 %vm1970_vm2, %v473_v43  ;;  %vm376_vm2 = vcmp.eq.s32.totalorder %v1651_v36, %v1448_v47 }
 0x15a   :  { %v1450_v48 = vpop.f32.mrb[0].mxu0 }
 0x15b   :  { %v1454_v49 = vpop.f32.mrb[1].mxu0  ;;  %307 = vst [vmem:[%s1965_s3 + $0x8] sm:$0xff] %v1450_v48  ;;  %v379_v50 = vsel %vm363_vm3, %v1450_v48, 0.0 }
 0x15c   :  { %306 = vst [vmem:[%s1965_s3] sm:$0xff] %v1454_v49  ;;  %v378_v51 = vsel %vm362_vm4, %v1454_v49, 0.0 }
 0x15d   :  { %v394_v52 = vadd.f32 %v379_v50, %v378_v51  ;;  %v427_v50 = vmul.f32 0.125, %v1450_v48 }
 0x162   :  { %v1480_v55 = vpop.f32.mrb[2].mxu0 }
 0x163   :  { %v1482_v56 = vpop.f32.mrb[3].mxu0  ;;  %309 = vst [vmem:[%s1965_s3 + $0x18] sm:$0xff] %v1480_v55  ;;  %v381_v60 = vsel %vm365_vm6, %v1480_v55, 0.0 }
 0x164   :  { %308 = vst [vmem:[%s1965_s3 + $0x10] sm:$0xff] %v1482_v56  ;;  %v380_v57 = vsel %vm364_vm5, %v1482_v56, 0.0 }
 0x165   :  { %v395_v58 = vadd.f32 %v394_v52, %v380_v57  ;;  %v426_v57 = vmul.f32 0.125, %v1454_v49  ;;  %v429_v49 = vmul.f32 0.125, %v1480_v55 }
 0x167   :  { %v396_v62 = vadd.f32 %v395_v58, %v381_v60 }
 0x16a   :  { %v1510_v63 = vpop.f32.mrb[4].mxu0 }
 0x16b   :  { %v1512_v0 = vpop.f32.mrb[5].mxu0  ;;  %311 = vst [vmem:[%s1965_s3 + $0x28] sm:$0xff] %v1510_v63  ;;  %v383_v4 = vsel %vm367_vm8, %v1510_v63, 0.0 }
 0x16c   :  { %310 = vst [vmem:[%s1965_s3 + $0x20] sm:$0xff] %v1512_v0  ;;  %v382_v1 = vsel %vm366_vm7, %v1512_v0, 0.0 }
 0x16d   :  { %v397_v2 = vadd.f32 %v396_v62, %v382_v1 }
 0x16f   :  { %v398_v6 = vadd.f32 %v397_v2, %v383_v4 }
 0x172   :  { %v1540_v7 = vpop.f32.mrb[6].mxu0 }
 0x173   :  { %v1542_v8 = vpop.f32.mrb[7].mxu0  ;;  %313 = vst [vmem:[%s1965_s3 + $0x38] sm:$0xff] %v1540_v7  ;;  %v385_v13 = vsel %vm369_vm10, %v1540_v7, 0.0 }
 0x174   :  { %312 = vst [vmem:[%s1965_s3 + $0x30] sm:$0xff] %v1542_v8  ;;  %v384_v9 = vsel %vm368_vm9, %v1542_v8, 0.0 }
 0x175   :  { %v399_v10 = vadd.f32 %v398_v6, %v384_v9 }
 0x177   :  { %v400_v15 = vadd.f32 %v399_v10, %v385_v13 }
 0x17a   :  { %v1570_v16 = vpop.f32.mrb[0].mxu1 }
 0x17b   :  { %v1572_v17 = vpop.f32.mrb[1].mxu1  ;;  %315 = vst [vmem:[%s1965_s3 + $0x48] sm:$0xff] %v1570_v16  ;;  %v387_v21 = vsel %vm371_vm12, %v1570_v16, 0.0 }
 0x17c   :  { %314 = vst [vmem:[%s1965_s3 + $0x40] sm:$0xff] %v1572_v17  ;;  %v386_v18 = vsel %vm370_vm11, %v1572_v17, 0.0 }
 0x17d   :  { %v401_v19 = vadd.f32 %v400_v15, %v386_v18 }
 0x17f   :  { %v402_v23 = vadd.f32 %v401_v19, %v387_v21 }
 0x182   :  { %v1600_v24 = vpop.f32.mrb[2].mxu1 }
 0x183   :  { %v1602_v25 = vpop.f32.mrb[3].mxu1  ;;  %317 = vst [vmem:[%s1965_s3 + $0x58] sm:$0xff] %v1600_v24  ;;  %v389_v29 = vsel %vm373_vm14, %v1600_v24, 0.0 }
 0x184   :  { %316 = vst [vmem:[%s1965_s3 + $0x50] sm:$0xff] %v1602_v25  ;;  %v388_v26 = vsel %vm372_vm13, %v1602_v25, 0.0 }
 0x185   :  { %v403_v27 = vadd.f32 %v402_v23, %v388_v26  ;;  %v428_v26 = vmul.f32 0.125, %v1482_v56  ;;  %v416_v56 = vmul.f32 %v1404_v11, %v1404_v11  ;;  %v430_v11 = vmul.f32 0.125, %v1512_v0 }
 0x187   :  { %v404_v31 = vadd.f32 %v403_v27, %v389_v29 }
 0x18a   :  { %v1630_v32 = vpop.f32.mrb[4].mxu1 }
 0x18b   :  { %v1632_v33 = vpop.f32.mrb[5].mxu1  ;;  %319 = vst [vmem:[%s1965_s3 + $0x68] sm:$0xff] %v1630_v32  ;;  %v391_v37 = vsel %vm375_vm1, %v1630_v32, 0.0 }
 0x18c   :  { %318 = vst [vmem:[%s1965_s3 + $0x60] sm:$0xff] %v1632_v33  ;;  %v390_v34 = vsel %vm1971_vm15, %v1632_v33, 0.0  ;;  %vm377_vm15 = vcmp.eq.s32.totalorder %v1658_v38, %v1448_v47 }
 0x18d   :  { %v405_v35 = vadd.f32 %v404_v31, %v390_v34 }
 0x18f   :  { %v406_v39 = vadd.f32 %v405_v35, %v391_v37 }
 0x192   :  { %v1660_v40 = vpop.f32.mrb[6].mxu1 }
 0x193   :  { %v1662_v41 = vpop.f32.mrb[7].mxu1  ;;  %321 = vst [vmem:[%s1965_s3 + $0x78] sm:$0xff] %v1660_v40  ;;  %v393_v44 = vsel %vm377_vm15, %v1660_v40, 0.0  ;;  %v441_v14 = vmul.f32 0.125, %v1660_v40 }
 0x194   :  { %320 = vst [vmem:[%s1965_s3 + $0x70] sm:$0xff] %v1662_v41  ;;  %v392_v42 = vsel %vm376_vm2, %v1662_v41, 0.0  ;;  %v440_v20 = vmul.f32 0.125, %v1662_v41 }
 0x195   :  { %v407_v43 = vadd.f32 %v406_v39, %v392_v42 }
 0x197   :  { %v408_v51 = vadd.f32 %v407_v43, %v393_v44 }
 0x199   :  { %v409_v62 = vrot.slane %v408_v51, 4 }
 0x19a   :  { %v1309_v52 = vpop.f32.mrb[8].mxu1 }
 0x19b   :  { %v673_v58 = vsub.f32 %v427_v50, %v1309_v52  ;;  %v593_v60 = vpop.f32.mrb[9].mxu1  ;;  %v689_v1 = vld [vmem:[%s1966_s1 + $0x8] sm:$0xff]  ;;  %v688_v6 = vld [vmem:[%s1966_s1] sm:$0xff]  ;;  %v410_v9 = vadd.f32 %v409_v62, %v408_v51  ;;  %v431_v52 = vmul.f32 0.125, %v1510_v63 }
 0x19c   :  { %v672_v2 = vsub.f32 %v426_v57, %v593_v60 }
 0x19d   :  { %v706_v4 = vsub.f32 %v673_v58, %v689_v1  ;;  %v411_v13 = vrot.slane %v410_v9, 2 }
 0x19e   :  { %v705_v10 = vsub.f32 %v672_v2, %v688_v6 }
 0x19f   :  { %v722_v48 = vmul.f32 0.05, %v706_v4  ;;  %v412_v19 = vadd.f32 %v411_v13, %v410_v9 }
 0x1a0   :  { %v721_v15 = vmul.f32 0.05, %v705_v10 }
 0x1a1   :  { %v1692_v18 = vadd.f32 %v722_v48, %v689_v1  ;;  %v413_v31 = vrot.slane %v412_v19, 1 }
 0x1a2   :  { %v1695_v21 = vadd.f32 %v721_v15, %v688_v6  ;;  %v1312_v23 = vpop.f32.mrb[10].mxu1  ;;  %v433_v15 = vmul.f32 0.125, %v1540_v7 }
 0x1a3   :  { %757 = vst [vmem:[%s1965_s3 + $0x8] sm:$0xff] %v1692_v18  ;;  %v675_v27 = vsub.f32 %v429_v49, %v1312_v23  ;;  %v603_v29 = vpop.f32.mrb[11].mxu1  ;;  %v414_v39 = vadd.f32 %v413_v31, %v412_v19  ;;  %v432_v23 = vmul.f32 0.125, %v1542_v8 }
 0x1a4   :  { %756 = vst [vmem:[%s1965_s3] sm:$0xff] %v1695_v21  ;;  %v674_v34 = vsub.f32 %v428_v26, %v603_v29  ;;  %v1095_v29 = vsel %vm363_vm3, %v1692_v18, 0.0  ;;  %v1094_v7 = vsel %vm362_vm4, %v1695_v21, 0.0 }
 0x1a5   :  { %v415_v44 = vmul.f32 0.125, %v414_v39 }
 0x1a7   :  { %v417_v57 = vsub.f32 %v415_v44, %v416_v56 }
 0x1a9   :  { %v418_v2 = vmax.f32 %v417_v57, 0.0  ;;  %v704_v57 = vld [vmem:[%s1967_s2] sm:$0x1] }
 0x1aa   :  { %v1315_v60 = vpop.f32.mrb[12].mxu1 }
 0x1ab   :  { %v691_v55 = vld [vmem:[%s1966_s1 + $0x18] sm:$0xff]  ;;  %v690_v37 = vld [vmem:[%s1966_s1 + $0x10] sm:$0xff]  ;;  %v677_v62 = vsub.f32 %v431_v52, %v1315_v60  ;;  %v613_v1 = vpop.f32.mrb[13].mxu1  ;;  %1360 = vrsqrt.f32 %v418_v2  ;;  %vm421_vm3 = vcmp.eq.f32.partialorder %v418_v2, inf  ;;  %v424_v52 = vand.u32 2147483648, %v418_v2 }
 0x1ac   :  { %v708_v35 = vsub.f32 %v675_v27, %v691_v55  ;;  %v707_v42 = vsub.f32 %v674_v34, %v690_v37  ;;  %v676_v4 = vsub.f32 %v430_v11, %v613_v1  ;;  %v434_v11 = vmul.f32 0.125, %v1572_v17 }
 0x1ad   :  { %vm423_vm4 = vcmp.eq.f32.partialorder %v418_v2, 0.0 }
 0x1ae   :  { %v724_v43 = vmul.f32 0.05, %v708_v35  ;;  %v723_v50 = vmul.f32 0.05, %v707_v42  ;;  %v1110_v35 = vadd.f32 %v1095_v29, %v1094_v7  ;;  %v435_v42 = vmul.f32 0.125, %v1570_v16 }
 0x1af   :  { %v437_v29 = vmul.f32 0.125, %v1600_v24  ;;  %v436_v7 = vmul.f32 0.125, %v1602_v25 }
 0x1b0   :  { %v1714_v51 = vadd.f32 %v724_v43, %v691_v55  ;;  %v1717_v58 = vadd.f32 %v723_v50, %v690_v37 }
 0x1b2   :  { %759 = vst [vmem:[%s1965_s3 + $0x18] sm:$0xff] %v1714_v51  ;;  %758 = vst [vmem:[%s1965_s3 + $0x10] sm:$0xff] %v1717_v58  ;;  %v1318_v19 = vpop.f32.mrb[14].mxu1  ;;  %v1096_v45 = vsel %vm364_vm5, %v1717_v58, 0.0  ;;  %vm773_vm5 = vcmp.lt.s32.totalorder %v1448_v47, 32 }
 0x1b3   :  { %v679_v26 = vsub.f32 %v433_v15, %v1318_v19  ;;  %v623_v27 = vpop.f32.mrb[15].mxu1  ;;  %v1111_v44 = vadd.f32 %v1110_v35, %v1096_v45 }
 0x1b4   :  { %v678_v31 = vsub.f32 %v432_v23, %v623_v27 }
 0x1b5   :  { %v1361_v56 = vpop.eup %1360 }
 0x1b6   :  { %v420_v43 = vmul.f32 %v1361_v56, %v418_v2 }
 0x1b9   :  { %v693_v63 = vld [vmem:[%s1966_s1 + $0x28] sm:$0xff]  ;;  %v692_v0 = vld [vmem:[%s1966_s1 + $0x20] sm:$0xff] }
 0x1ba   :  { %v710_v6 = vsub.f32 %v677_v62, %v693_v63  ;;  %v709_v9 = vsub.f32 %v676_v4, %v692_v0  ;;  %v1321_v53 = vpop.f32.mrb[16].mxu1  ;;  %v422_v62 = vsel %vm421_vm3, %v418_v2, %v420_v43  ;;  %v1097_v4 = vsel %vm365_vm6, %v1714_v51, 0.0 }
 0x1bb   :  { %v681_v16 = vsub.f32 %v435_v42, %v1321_v53  ;;  %v633_v1 = vpop.f32.mrb[17].mxu1  ;;  %v439_v53 = vmul.f32 0.125, %v1630_v32  ;;  %vm1972_vm6 = vcmp.eq.s32.totalorder %v1621_v28, %v1448_v47 }
 0x1bc   :  { %v726_v10 = vmul.f32 0.05, %v710_v6  ;;  %v725_v48 = vmul.f32 0.05, %v709_v9  ;;  %v680_v6 = vsub.f32 %v434_v11, %v633_v1  ;;  %v1112_v9 = vadd.f32 %v1111_v44, %v1097_v4 }
 0x1be   :  { %v1734_v13 = vadd.f32 %v726_v10, %v693_v63  ;;  %v1737_v49 = vadd.f32 %v725_v48, %v692_v0  ;;  %v425_v63 = vsel %vm423_vm4, %v424_v52, %v422_v62 }
 0x1bf   :  { %v753_v0 = vsub.f32 %v425_v63, %v704_v57 }
 0x1c0   :  { %761 = vst [vmem:[%s1965_s3 + $0x28] sm:$0xff] %v1734_v13  ;;  %760 = vst [vmem:[%s1965_s3 + $0x20] sm:$0xff] %v1737_v49  ;;  %v1098_v17 = vsel %vm366_vm7, %v1737_v49, 0.0  ;;  %vm1973_vm7 = vcmask 7168  }
 0x1c1   :  { %v754_v59 = vmul.f32 0.05, %v753_v0  ;;  %v1113_v15 = vadd.f32 %v1112_v9, %v1098_v17 }
 0x1c7   :  { %v695_v8 = vld [vmem:[%s1966_s1 + $0x38] sm:$0xff]  ;;  %v694_v46 = vld [vmem:[%s1966_s1 + $0x30] sm:$0xff] }
 0x1c8   :  { %v712_v55 = vsub.f32 %v679_v26, %v695_v8  ;;  %v711_v34 = vsub.f32 %v678_v31, %v694_v46  ;;  %v1797_v26 = vadd.f32 %v754_v59, %v704_v57 }
 0x1ca   :  { %v728_v37 = vmul.f32 0.05, %v712_v55  ;;  %v727_v39 = vmul.f32 0.05, %v711_v34  ;;  %1362 = vrcp.f32 %v1797_v26  ;;  %772 = vst [vmem:[%s1968_s4] sm:$0x1] %v1797_v26 }
 0x1cc   :  { %v1767_v50 = vadd.f32 %v728_v37, %v695_v8  ;;  %v1772_v60 = vadd.f32 %v727_v39, %v694_v46  ;;  %v1099_v8 = vsel %vm367_vm8, %v1734_v13, 0.0  ;;  %v1324_v46 = vpop.f32.mrb[18].mxu1 }
 0x1cd   :  { %v1114_v24 = vadd.f32 %v1113_v15, %v1099_v8  ;;  %v683_v61 = vsub.f32 %v437_v29, %v1324_v46  ;;  %v643_v25 = vpop.f32.mrb[19].mxu1 }
 0x1ce   :  { %763 = vst [vmem:[%s1965_s3 + $0x38] sm:$0xff] %v1767_v50  ;;  %762 = vst [vmem:[%s1965_s3 + $0x30] sm:$0xff] %v1772_v60  ;;  %v1100_v31 = vsel %vm368_vm9, %v1772_v60, 0.0  ;;  %v682_v45 = vsub.f32 %v436_v7, %v643_v25  ;;  %v1101_v42 = vsel %vm369_vm10, %v1767_v50, 0.0  ;;  %v1327_v62 = vpop.f32.mrb[20].mxu1 }
 0x1cf   :  { %v1115_v34 = vadd.f32 %v1114_v24, %v1100_v31  ;;  %v685_v12 = vsub.f32 %v439_v53, %v1327_v62  ;;  %v653_v1 = vpop.f32.mrb[21].mxu1 }
 0x1d1   :  { %v1116_v52 = vadd.f32 %v1115_v34, %v1101_v42 }
 0x1d4   :  { %v1363_v63 = vpop.eup %1362 }
 0x1d5   :  { %v697_v2 = vld [vmem:[%s1966_s1 + $0x48] sm:$0xff]  ;;  %v696_v54 = vld [vmem:[%s1966_s1 + $0x40] sm:$0xff] }
 0x1d6   :  { %v714_v10 = vsub.f32 %v681_v16, %v697_v2  ;;  %v713_v48 = vsub.f32 %v680_v6, %v696_v54  ;;  %v438_v16 = vmul.f32 0.125, %v1632_v33 }
 0x1d8   :  { %v730_v19 = vmul.f32 0.05, %v714_v10  ;;  %v729_v23 = vmul.f32 0.05, %v713_v48  ;;  %v684_v33 = vsub.f32 %v438_v16, %v653_v1 }
 0x1da   :  { %v1799_v27 = vadd.f32 %v730_v19, %v697_v2  ;;  %v1811_v55 = vadd.f32 %v729_v23, %v696_v54  ;;  %v776_v2 = vsel %vm773_vm5, %v1363_v63, 0.0  ;;  %v1330_v23 = vpop.f32.mrb[22].mxu1 }
 0x1db   :  { %777 = vxpose.xlu1.b32.start.end [1/1] (short) %v776_v2, 128  ;;  %1331 = vmatprep.subr.msk.mxu0 %vm523_vm0, %v776_v2  ;;  %v687_v29 = vsub.f32 %v441_v14, %v1330_v23  ;;  %v663_v7 = vpop.f32.mrb[23].mxu1 }
 0x1dc   :  { %765 = vst [vmem:[%s1965_s3 + $0x48] sm:$0xff] %v1799_v27  ;;  %764 = vst [vmem:[%s1965_s3 + $0x40] sm:$0xff] %v1811_v55  ;;  %v1102_v43 = vsel %vm370_vm11, %v1811_v55, 0.0  ;;  %v1103_v6 = vsel %vm371_vm12, %v1799_v27, 0.0  ;;  %1332 = vmatpush3.msk.msra.mxu0 %vm523_vm0, %v776_v2  ;;  %v686_v31 = vsub.f32 %v440_v20, %v663_v7 }
 0x1dd   :  { %v1117_v5 = vadd.f32 %v1116_v52, %v1102_v43 }
 0x1df   :  { %v1118_v10 = vadd.f32 %v1117_v5, %v1103_v6 }
 0x1e3   :  { %v699_v3 = vld [vmem:[%s1966_s1 + $0x58] sm:$0xff]  ;;  %v698_v35 = vld [vmem:[%s1966_s1 + $0x50] sm:$0xff] }
 0x1e4   :  { %v716_v56 = vsub.f32 %v683_v61, %v699_v3  ;;  %v715_v37 = vsub.f32 %v682_v45, %v698_v35 }
 0x1e6   :  { %v732_v39 = vmul.f32 0.05, %v716_v56  ;;  %v731_v44 = vmul.f32 0.05, %v715_v37 }
 0x1e8   :  { %v1840_v57 = vadd.f32 %v732_v39, %v699_v3  ;;  %v1843_v11 = vadd.f32 %v731_v44, %v698_v35 }
 0x1ea   :  { %767 = vst [vmem:[%s1965_s3 + $0x58] sm:$0xff] %v1840_v57  ;;  %766 = vst [vmem:[%s1965_s3 + $0x50] sm:$0xff] %v1843_v11  ;;  %v1104_v0 = vsel %vm372_vm13, %v1843_v11, 0.0  ;;  %v1105_v8 = vsel %vm373_vm14, %v1840_v57, 0.0 }
 0x1eb   :  { %v1119_v59 = vadd.f32 %v1118_v10, %v1104_v0 }
 0x1ed   :  { %v1120_v46 = vadd.f32 %v1119_v59, %v1105_v8 }
 0x1f1   :  { %v701_v32 = vld [vmem:[%s1966_s1 + $0x68] sm:$0xff]  ;;  %v700_v17 = vld [vmem:[%s1966_s1 + $0x60] sm:$0xff] }
 0x1f2   :  { %v718_v4 = vsub.f32 %v685_v12, %v701_v32  ;;  %v717_v9 = vsub.f32 %v684_v33, %v700_v17 }
 0x1f4   :  { %v734_v54 = vmul.f32 0.05, %v718_v4  ;;  %v733_v48 = vmul.f32 0.05, %v717_v9 }
 0x1f6   :  { %v1871_v15 = vadd.f32 %v734_v54, %v701_v32  ;;  %v1874_v19 = vadd.f32 %v733_v48, %v700_v17 }
 0x1f8   :  { %769 = vst [vmem:[%s1965_s3 + $0x68] sm:$0xff] %v1871_v15  ;;  %768 = vst [vmem:[%s1965_s3 + $0x60] sm:$0xff] %v1874_v19  ;;  %v1106_v40 = vsel %vm1972_vm6, %v1874_v19, 0.0  ;;  %v1107_v28 = vsel %vm375_vm1, %v1871_v15, 0.0 }
 0x1f9   :  { %v1121_v25 = vadd.f32 %v1120_v46, %v1106_v40 }
 0x1fb   :  { %v1122_v35 = vadd.f32 %v1121_v25, %v1107_v28 }
 0x1ff   :  { %v703_v41 = vld [vmem:[%s1966_s1 + $0x78] sm:$0xff]  ;;  %v702_v22 = vld [vmem:[%s1966_s1 + $0x70] sm:$0xff] }
 0x200   :  { %v720_v24 = vsub.f32 %v687_v29, %v703_v41  ;;  %v719_v61 = vsub.f32 %v686_v31, %v702_v22 }
 0x202   :  { %v736_v3 = vmul.f32 0.05, %v720_v24  ;;  %v735_v45 = vmul.f32 0.05, %v719_v61 }
 0x204   :  { %v1899_v34 = vadd.f32 %v736_v3, %v703_v41  ;;  %v1905_v56 = vadd.f32 %v735_v45, %v702_v22 }
 0x206   :  { %771 = vst [vmem:[%s1965_s3 + $0x78] sm:$0xff] %v1899_v34  ;;  %770 = vst [vmem:[%s1965_s3 + $0x70] sm:$0xff] %v1905_v56  ;;  %v1108_v37 = vsel %vm376_vm2, %v1905_v56, 0.0  ;;  %v1109_v39 = vsel %vm377_vm15, %v1899_v34, 0.0 }
 0x207   :  { %v1123_v30 = vadd.f32 %v1122_v35, %v1108_v37  ;;  %vm1974_vm2 = vmmov %vm1973_vm7 }
 0x208   :  { %vm1975_vm8 = vmmov %vm1974_vm2 }
 0x209   :  { %v1124_v42 = vadd.f32 %v1123_v30, %v1109_v39  ;;  %vm1976_vm9 = vmmov %vm1974_vm2 }
 0x20a   :  { %vm1977_vm10 = vmmov %vm1974_vm2 }
 0x20b   :  { %v1125_v43 = vrot.slane %v1124_v42, 4  ;;  %vm1978_vm11 = vmmov %vm1974_vm2 }
 0x20c   :  { %vm1979_vm12 = vmmov %vm1974_vm2 }
 0x20d   :  { %v1126_v44 = vadd.f32 %v1125_v43, %v1124_v42  ;;  %vm1980_vm13 = vmmov %vm1974_vm2 }
 0x20e   :  { %vm1981_vm14 = vmmov %vm1974_vm2 }
 0x20f   :  { %v1127_v52 = vrot.slane %v1126_v44, 2  ;;  %vm1982_vm15 = vmmov %vm1974_vm2 }
 0x210   :  { %vm1983_vm1 = vmmov %vm1974_vm2 }
 0x211   :  { %v1128_v53 = vadd.f32 %v1127_v52, %v1126_v44  ;;  %vm1984_vm3 = vmmov %vm1983_vm1 }
 0x212   :  { %vm1985_vm4 = vmmov %vm1983_vm1 }
 0x213   :  { %v1129_v62 = vrot.slane %v1128_v53, 1  ;;  %vm1986_vm5 = vmmov %vm1983_vm1 }
 0x214   :  { %vm1987_vm6 = vmmov %vm1983_vm1 }
 0x215   :  { %v1923_v16 = vadd.f32 %v1129_v62, %v1128_v53 }
 0x217   :  { %1131 = vadd.xlane.f32.xlu0 %v1923_v16 }
 0x25b   :  { %v793_v5 = vpop.trf.xlu1 }
 0x25c   :  { %1333 = vmatprep.mubr.msk.f32.mxu0 %vm1973_vm7, %v793_v5  ;;  %vm1988_vm7 = vmmov %vm1983_vm1 }
 0x25f   :  { %v794_v36 = vpop.trf.xlu1 }
 0x260   :  { %1334 = vmatmul.mubr.msk.f32.vlgmr.msra.gmra.mrb[8].mxu0 %vm1974_vm2, %v794_v36 }
 0x263   :  { %v795_v12 = vpop.trf.xlu1 }
 0x264   :  { %1336 = vmatprep.mubr.msk.f32.mxu0 %vm1975_vm8, %v795_v12 }
 0x267   :  { %v796_v47 = vpop.trf.xlu1 }
 0x268   :  { %1337 = vmatmul.mubr.msk.f32.gmra.mrb[10].mxu0 %vm1976_vm9, %v796_v47 }
 0x26b   :  { %v797_v38 = vpop.trf.xlu1 }
 0x26c   :  { %1339 = vmatprep.mubr.msk.f32.mxu0 %vm1977_vm10, %v797_v38 }
 0x26f   :  { %v798_v1 = vpop.trf.xlu1 }
 0x270   :  { %1340 = vmatmul.mubr.msk.f32.gmra.mrb[12].mxu0 %vm1978_vm11, %v798_v1 }
 0x273   :  { %v799_v63 = vpop.trf.xlu1 }
 0x274   :  { %1342 = vmatprep.mubr.msk.f32.mxu0 %vm1979_vm12, %v799_v63 }
 0x277   :  { %v800_v32 = vpop.trf.xlu1 }
 0x278   :  { %1343 = vmatmul.mubr.msk.f32.gmra.mrb[14].mxu0 %vm1980_vm13, %v800_v32 }
 0x27b   :  { %v801_v33 = vpop.trf.xlu1 }
 0x27c   :  { %1345 = vmatprep.mubr.msk.f32.mxu0 %vm1981_vm14, %v801_v33 }
 0x27f   :  { %v802_v4 = vpop.trf.xlu1 }
 0x280   :  { %1346 = vmatmul.mubr.msk.f32.gmra.mrb[16].mxu0 %vm1982_vm15, %v802_v4 }
 0x283   :  { %v803_v17 = vpop.trf.xlu1 }
 0x284   :  { %1348 = vmatprep.mubr.msk.f32.mxu0 %vm1983_vm1, %v803_v17 }
 0x287   :  { %v804_v2 = vpop.trf.xlu1 }
 0x288   :  { %1349 = vmatmul.mubr.msk.f32.gmra.mrb[18].mxu0 %vm1984_vm3, %v804_v2 }
 0x28b   :  { %v805_v6 = vpop.trf.xlu1 }
 0x28c   :  { %1351 = vmatprep.mubr.msk.f32.mxu0 %vm1985_vm4, %v805_v6 }
 0x28f   :  { %v806_v0 = vpop.trf.xlu1 }
 0x290   :  { %1352 = vmatmul.mubr.msk.f32.gmra.mrb[20].mxu0 %vm1986_vm5, %v806_v0 }
 0x293   :  { %v807_v9 = vpop.trf.xlu1 }
 0x294   :  { %1354 = vmatprep.mubr.msk.f32.mxu0 %vm1987_vm6, %v807_v9 }
 0x297   :  { %v808_v10 = vpop.trf.xlu1 }
 0x298   :  { %1355 = vmatmul.mubr.msk.f32.gmra.mrb[22].mxu0 %vm1988_vm7, %v808_v10 }
 0x333   :  { %v1335_v54 = vpop.f32.mrb[8].mxu0 }
 0x334   :  { %v1006_v48 = vmul.f32 %v1335_v54, %v1692_v18  ;;  %v926_v59 = vpop.f32.mrb[9].mxu0 }
 0x335   :  { %v1005_v14 = vmul.f32 %v926_v59, %v1695_v21 }
 0x336   :  { %v1213_v23 = vclamps-f32 %v1006_v48, 1.0 }
 0x337   :  { %v1212_v20 = vclamps-f32 %v1005_v14, 1.0 }
 0x338   :  { %v1054_v29 = vmul.f32 %v1213_v23, %v1213_v23 }
 0x339   :  { %v1053_v7 = vmul.f32 %v1212_v20, %v1212_v20 }
 0x33b   :  { %v1069_v8 = vadd.f32 %v1054_v29, %v1053_v7  ;;  %v1338_v40 = vpop.f32.mrb[10].mxu0 }
 0x33c   :  { %v1008_v41 = vmul.f32 %v1338_v40, %v1714_v51  ;;  %v936_v31 = vpop.f32.mrb[11].mxu0 }
 0x33d   :  { %v1007_v46 = vmul.f32 %v936_v31, %v1717_v58 }
 0x33e   :  { %v1215_v24 = vclamps-f32 %v1008_v41, 1.0 }
 0x33f   :  { %v1214_v22 = vclamps-f32 %v1007_v46, 1.0 }
 0x340   :  { %v1056_v25 = vmul.f32 %v1215_v24, %v1215_v24 }
 0x341   :  { %v1055_v61 = vmul.f32 %v1214_v22, %v1214_v22 }
 0x343   :  { %v1070_v3 = vadd.f32 %v1069_v8, %v1055_v61  ;;  %v1341_v18 = vpop.f32.mrb[12].mxu0 }
 0x344   :  { %v1010_v45 = vmul.f32 %v1341_v18, %v1734_v13  ;;  %v946_v21 = vpop.f32.mrb[13].mxu0 }
 0x345   :  { %v1009_v28 = vmul.f32 %v946_v21, %v1737_v49  ;;  %v1071_v35 = vadd.f32 %v1070_v3, %v1056_v25 }
 0x346   :  { %v1217_v37 = vclamps-f32 %v1010_v45, 1.0 }
 0x347   :  { %v1216_v30 = vclamps-f32 %v1009_v28, 1.0 }
 0x348   :  { %v1058_v42 = vmul.f32 %v1217_v37, %v1217_v37 }
 0x349   :  { %v1057_v39 = vmul.f32 %v1216_v30, %v1216_v30 }
 0x34b   :  { %v1072_v51 = vadd.f32 %v1071_v35, %v1057_v39  ;;  %v1344_v43 = vpop.f32.mrb[14].mxu0 }
 0x34c   :  { %v1012_v58 = vmul.f32 %v1344_v43, %v1767_v50  ;;  %v956_v44 = vpop.f32.mrb[15].mxu0 }
 0x34d   :  { %v1011_v52 = vmul.f32 %v956_v44, %v1772_v60  ;;  %v1073_v53 = vadd.f32 %v1072_v51, %v1058_v42 }
 0x34e   :  { %v1219_v62 = vclamps-f32 %v1012_v58, 1.0 }
 0x34f   :  { %v1218_v5 = vclamps-f32 %v1011_v52, 1.0 }
 0x350   :  { %v1060_v13 = vmul.f32 %v1219_v62, %v1219_v62  ;;  %v1132_v62 = vpop.xlane.xlu0 %1131 }
 0x351   :  { %v1059_v36 = vmul.f32 %v1218_v5, %v1218_v5 }
 0x353   :  { %v1074_v12 = vadd.f32 %v1073_v53, %v1059_v36  ;;  %v1347_v47 = vpop.f32.mrb[16].mxu0 }
 0x354   :  { %v1014_v49 = vmul.f32 %v1347_v47, %v1799_v27  ;;  %v966_v38 = vpop.f32.mrb[17].mxu0 }
 0x355   :  { %v1013_v1 = vmul.f32 %v966_v38, %v1811_v55  ;;  %v1075_v63 = vadd.f32 %v1074_v12, %v1060_v13 }
 0x356   :  { %v1221_v32 = vclamps-f32 %v1014_v49, 1.0 }
 0x357   :  { %v1220_v33 = vclamps-f32 %v1013_v1, 1.0 }
 0x358   :  { %v1062_v50 = vmul.f32 %v1221_v32, %v1221_v32 }
 0x359   :  { %v1061_v4 = vmul.f32 %v1220_v33, %v1220_v33 }
 0x35b   :  { %v1076_v17 = vadd.f32 %v1075_v63, %v1061_v4  ;;  %v1350_v2 = vpop.f32.mrb[18].mxu0 }
 0x35c   :  { %v1016_v60 = vmul.f32 %v1350_v2, %v1840_v57  ;;  %v976_v6 = vpop.f32.mrb[19].mxu0 }
 0x35d   :  { %v1015_v0 = vmul.f32 %v976_v6, %v1843_v11  ;;  %v1077_v9 = vadd.f32 %v1076_v17, %v1062_v50 }
 0x35e   :  { %v1223_v10 = vclamps-f32 %v1016_v60, 1.0 }
 0x35f   :  { %v1222_v54 = vclamps-f32 %v1015_v0, 1.0 }
 0x360   :  { %v1064_v27 = vmul.f32 %v1223_v10, %v1223_v10 }
 0x361   :  { %v1063_v48 = vmul.f32 %v1222_v54, %v1222_v54 }
 0x363   :  { %v1078_v59 = vadd.f32 %v1077_v9, %v1063_v48  ;;  %v1353_v14 = vpop.f32.mrb[20].mxu0 }
 0x364   :  { %v1018_v55 = vmul.f32 %v1353_v14, %v1871_v15  ;;  %v986_v23 = vpop.f32.mrb[21].mxu0 }
 0x365   :  { %v1017_v20 = vmul.f32 %v986_v23, %v1874_v19  ;;  %v1079_v29 = vadd.f32 %v1078_v59, %v1064_v27 }
 0x366   :  { %v1225_v7 = vclamps-f32 %v1018_v55, 1.0 }
 0x367   :  { %v1224_v8 = vclamps-f32 %v1017_v20, 1.0 }
 0x368   :  { %v1066_v57 = vmul.f32 %v1225_v7, %v1225_v7 }
 0x369   :  { %v1065_v40 = vmul.f32 %v1224_v8, %v1224_v8 }
 0x36b   :  { %v1080_v41 = vadd.f32 %v1079_v29, %v1065_v40  ;;  %v1356_v31 = vpop.f32.mrb[22].mxu0 }
 0x36c   :  { %v1020_v11 = vmul.f32 %v1356_v31, %v1899_v34  ;;  %v996_v46 = vpop.f32.mrb[23].mxu0 }
 0x36d   :  { %v1019_v24 = vmul.f32 %v996_v46, %v1905_v56  ;;  %v1081_v22 = vadd.f32 %v1080_v41, %v1066_v57 }
 0x36e   :  { %v1227_v61 = vclamps-f32 %v1020_v11, 1.0 }
 0x36f   :  { %v1226_v25 = vclamps-f32 %v1019_v24, 1.0 }
 0x370   :  { %v1068_v15 = vmul.f32 %v1227_v61, %v1227_v61 }
 0x371   :  { %v1067_v3 = vmul.f32 %v1226_v25, %v1226_v25 }
 0x373   :  { %v1082_v18 = vadd.f32 %v1081_v22, %v1067_v3 }
 0x375   :  { %v1083_v45 = vadd.f32 %v1082_v18, %v1068_v15 }
 0x377   :  { %v1084_v19 = vrot.slane %v1083_v45, 4 }
 0x379   :  { %v1085_v21 = vadd.f32 %v1084_v19, %v1083_v45 }
 0x37b   :  { %v1086_v28 = vrot.slane %v1085_v21, 2 }
 0x37d   :  { %v1087_v35 = vadd.f32 %v1086_v28, %v1085_v21 }
 0x37f   :  { %v1088_v37 = vrot.slane %v1087_v35, 1 }
 0x381   :  { %v1089_v30 = vadd.f32 %v1088_v37, %v1087_v35 }
 0x383   :  { %v1090_v39 = vmul.f32 0.03125, %v1089_v30 }
 0x385   :  { %v1091_v42 = vmul.f32 %v1090_v39, %v1797_v26 }
 0x387   :  { %v1092_v34 = vadd.f32 0.001, %v1091_v42 }
 0x389   :  { %1364 = vrsqrt.f32 %v1092_v34 }
 0x393   :  { %v1365_v51 = vpop.eup %1364 }
 0x394   :  { %v1133_v56 = vmul.f32 %v1365_v51, %v1923_v16 }
 0x396   :  { %v1134_v43 = vmul.f32 %v1365_v51, %v1133_v56 }
 0x398   :  { %v1135_v58 = vsel %vm523_vm0, %v1134_v43, 0.0 }
 0x399   :  { %1136 = vadd.xlane.f32.xlu1 %v1135_v58 }
 0x426   :  { %v1137_v44 = vpop.xlane.xlu1 %1136 }
 0x427   :  { %v1138_v52 = vadd.f32 0.001, %v1137_v44 }
 0x429   :  { %1366 = vrcp.f32 %v1138_v52 }
 0x433   :  { %v1367_v53 = vpop.eup %1366 }
 0x434   :  { %v1140_v5 = vmul.f32 %v1367_v53, %v1132_v62 }
 0x436   :  { %1368 = vrsqrt.f32 %v1140_v5  ;;  %vm1143_vm2 = vcmp.eq.f32.partialorder %v1140_v5, inf  ;;  %v1146_v26 = vand.u32 2147483648, %v1140_v5  ;;  %vm1145_vm8 = vcmp.eq.f32.partialorder %v1140_v5, 0.0 }
 0x440   :  { %v1369_v36 = vpop.eup %1368 }
 0x441   :  { %v1142_v13 = vmul.f32 %v1369_v36, %v1140_v5 }
 0x443   :  { %v1144_v12 = vsel %vm1143_vm2, %v1140_v5, %v1142_v13 }
 0x444   :  { %v1147_v47 = vsel %vm1145_vm8, %v1146_v26, %v1144_v12 }
 0x445   :  { %v1148_v49 = vmul.f32 %v1365_v51, %v1147_v47 }
 0x447   :  { %1149 = vst [vmem:[%s1969_s5] sm:$0x1] %v1148_v49 }

</bundles_post_ra>
